<compile_context>
chip_gen: v6e
topology: v6e:2x2x1
jax: 0.10.0
libtpu: 0.0.40
codegen_flags: <defaults>
</compile_context>

<pallas_src>
import jax
import jax.numpy as jnp
from jax.experimental import pallas as pl
from jax.experimental.pallas import tpu as pltpu

STATE_DIM = 8
ACTION_DIM = 3
IN_DIM = STATE_DIM + ACTION_DIM          # 11, as in the PyTorch module
HIDDEN = 256
OUT_DIM = 1

TM_MAX = 512                             # max batch rows per grid step


def _round_up(x, m):
    return ((x + m - 1) // m) * m


def _cdiv(a, b):
    return -(-a // b)


def _cores_per_chip():
    """Number of TensorCores a 'parallel' grid axis can be sharded over."""
    try:
        kind = jax.devices()[0].device_kind.lower()
    except Exception:  # pragma: no cover - be conservative
        return 1
    if "v7" in kind or "7x" in kind:
        return 2            # v7x: two TensorCores per chip
    if "v4" in kind or "v5p" in kind:
        return 2            # megacore
    return 1                # v5e / v6e: single TensorCore


def _choose_tile(batch, n_cores):
    """Pick (TM, B_pad) with TM a multiple of 8 and B_pad a multiple of TM.

    Single-TC chips: one grid step when the 8-padded batch fits TM_MAX
    (no pointless extra per-step overhead), else the minimum number of steps.
    Multi-TC chips: an even number of grid steps so both cores get equal work.
    """
    b8 = _round_up(max(batch, 1), 8)
    if n_cores <= 1 or b8 <= 8:
        if b8 <= TM_MAX:
            return b8, b8
        steps = _cdiv(b8, TM_MAX)
        tm = _round_up(_cdiv(b8, steps), 8)
        return tm, tm * steps
    steps = max(2, 2 * _cdiv(b8, 2 * TM_MAX))   # even step count for balance
    tm = _round_up(_cdiv(b8, steps), 8)
    return tm, tm * steps


def _qnet_kernel(x_ref, w1_ref, b1_ref, w2_ref, b2_ref, w3_ref, b3_ref, o_ref):
    """One batch tile of the 3-layer MLP (x = [state | action], 11 lanes)."""
    # Layer 1: single merged [TM,11]@[11,256] MXU pass (f32 for precision;
    # K=11 is one pass regardless of dtype).
    h1 = (jnp.dot(x_ref[...], w1_ref[...], preferred_element_type=jnp.float32)
          + b1_ref[...])
    h1 = jnp.maximum(h1, 0.0)

    # Layer 2: bf16 operands (MXU-native), f32 accumulation.  Bias add and
    # ReLU stay f32 (v5e VPU has no bf16 path).
    h2 = (jnp.dot(h1.astype(jnp.bfloat16), w2_ref[...],
                  preferred_element_type=jnp.float32)
          + b2_ref[...])
    h2 = jnp.maximum(h2, 0.0)

    # Layer 3 off the MXU: VPU multiply + XLU lane reduce against the [1,256]
    # W3 row, producing the lane-minimal [TM,1] q column.
    o_ref[...] = (jnp.sum(h2 * w3_ref[...], axis=-1, keepdims=True)
                  + b3_ref[...])


def prepare_params(params):
    """One-time weight prep (outside the jitted forward):
    W1 whole [11,256] f32, W2 bf16 (MXU operand), W3 as a [1,256] row,
    biases reshaped to [1,F]."""
    w1, b1, w2, b2, w3, b3 = params
    return (jnp.asarray(w1, jnp.float32),                        # [11, 256]
            jnp.asarray(b1, jnp.float32).reshape(1, HIDDEN),     # [1, 256]
            jnp.asarray(w2, jnp.bfloat16),                       # [256, 256] bf16
            jnp.asarray(b2, jnp.float32).reshape(1, HIDDEN),     # [1, 256]
            jnp.asarray(w3, jnp.float32).reshape(1, HIDDEN),     # [1, 256] row
            jnp.asarray(b3, jnp.float32).reshape(1, OUT_DIM))    # [1, 1]


@jax.jit
def qnet_forward(state, action, prepared):
    """state: [B, 8], action: [B, 3] -> q: [B, 1] (float32)."""
    w1, b1, w2, b2, w3, b3 = prepared
    state = state.astype(jnp.float32)
    action = action.astype(jnp.float32)

    B = state.shape[0]
    tm, b_pad = _choose_tile(B, _cores_per_chip())

    # Concat (and any batch pad) happen once in the wrapper; XLA fuses them.
    # The result is an unpadded 11-lane slab -- same HBM bytes as state+action.
    x = jnp.concatenate([state, action], axis=1)                 # [B, 11]
    if b_pad != B:
        x = jnp.pad(x, ((0, b_pad - B), (0, 0)))

    grid = (b_pad // tm,)

    out = pl.pallas_call(
        _qnet_kernel,
        out_shape=jax.ShapeDtypeStruct((b_pad, OUT_DIM), jnp.float32),
        grid_spec=pltpu.PrefetchScalarGridSpec(
            num_scalar_prefetch=0,
            grid=grid,
            in_specs=[
                pl.BlockSpec((tm, IN_DIM), lambda i: (i, 0)),       # x tile
                pl.BlockSpec((IN_DIM, HIDDEN), lambda i: (0, 0)),   # W1
                pl.BlockSpec((1, HIDDEN), lambda i: (0, 0)),        # b1
                pl.BlockSpec((HIDDEN, HIDDEN), lambda i: (0, 0)),   # W2 (bf16)
                pl.BlockSpec((1, HIDDEN), lambda i: (0, 0)),        # b2
                pl.BlockSpec((1, HIDDEN), lambda i: (0, 0)),        # W3 row
                pl.BlockSpec((1, OUT_DIM), lambda i: (0, 0)),       # b3
            ],
            out_specs=pl.BlockSpec((tm, OUT_DIM), lambda i: (i, 0)),
        ),
        compiler_params=pltpu.CompilerParams(
            dimension_semantics=("parallel",)),
    )(x, w1, b1, w2, b2, w3, b3)

    return out[:B]


def init_params(key):
    """Deterministic init matching PyTorch Linear shapes (stored as [in, out])."""
    k1, k2, k3, k4, k5, k6 = jax.random.split(key, 6)

    def lin_init(kw, kb, fan_in, fan_out):
        bound = 1.0 / jnp.sqrt(float(fan_in))
        w = jax.random.uniform(kw, (fan_in, fan_out), jnp.float32, -bound, bound)
        b = jax.random.uniform(kb, (fan_out,), jnp.float32, -bound, bound)
        return w, b

    w1, b1 = lin_init(k1, k2, IN_DIM, HIDDEN)
    w2, b2 = lin_init(k3, k4, HIDDEN, HIDDEN)
    w3, b3 = lin_init(k5, k6, HIDDEN, OUT_DIM)
    return (w1, b1, w2, b2, w3, b3)


def _reference_forward(state, action, params):
    """Pure-JAX f32 reference for correctness checks."""
    w1, b1, w2, b2, w3, b3 = params
    x = jnp.concatenate([state, action], axis=1)
    h1 = jnp.maximum(x @ w1 + b1, 0.0)
    h2 = jnp.maximum(h1 @ w2 + b2, 0.0)
    return h2 @ w3 + b3


# TODO(synk): the Adam optimizer attached to the PyTorch module is training
# machinery with no forward-pass Pallas equivalent; only forward is implemented.

if __name__ == "__main__":
    key = jax.random.PRNGKey(0)
    kp, ks, ka = jax.random.split(key, 3)

    params = init_params(kp)
    prepared = prepare_params(params)

    # bf16 layer-2 operands -> loosen tolerance vs the f32 reference.
    ATOL = RTOL = 2e-2

    # Small check (B=2): single 8-row tile, batch padding path.
    B = 2
    state = jax.random.normal(ks, (B, STATE_DIM), jnp.float32)
    action = jax.random.normal(ka, (B, ACTION_DIM), jnp.float32)

    q = jax.block_until_ready(qnet_forward(state, action, prepared))
    q_ref = _reference_forward(state, action, params)
    assert q.shape == (B, 1), q.shape
    assert jnp.allclose(q, q_ref, atol=ATOL, rtol=RTOL), (q, q_ref)

    # Larger check (B=300): exercises multi-step grid (on 2-TC chips) and
    # ragged batch padding.
    B2 = 300
    state2 = jax.random.normal(ks, (B2, STATE_DIM), jnp.float32)
    action2 = jax.random.normal(ka, (B2, ACTION_DIM), jnp.float32)
    q2 = jax.block_until_ready(qnet_forward(state2, action2, prepared))
    q2_ref = _reference_forward(state2, action2, params)
    assert q2.shape == (B2, 1), q2.shape
    assert jnp.allclose(q2, q2_ref, atol=ATOL, rtol=RTOL)

    print("KERNEL_OK")
</pallas_src>

<mosaic_0001>
module attributes {stable_mosaic.version = 11 : i64} {
  func.func @_qnet_kernel(%arg0: i32, %arg1: memref<8x11xf32, #tpu.memory_space<vmem>>, %arg2: memref<11x256xf32, #tpu.memory_space<vmem>>, %arg3: memref<1x256xf32, #tpu.memory_space<vmem>>, %arg4: memref<256x256xbf16, #tpu.memory_space<vmem>>, %arg5: memref<1x256xf32, #tpu.memory_space<vmem>>, %arg6: memref<1x256xf32, #tpu.memory_space<vmem>>, %arg7: memref<1x1xf32, #tpu.memory_space<vmem>>, %arg8: memref<8x1xf32, #tpu.memory_space<vmem>>) attributes {dimension_semantics = [#tpu.dimension_semantics<parallel>], iteration_bounds = array<i64: 1>, scalar_prefetch = 0 : i64, scratch_operands = 0 : i64, tpu.core_type = #tpu.core_type<tc>, window_params = [{transform_indices = @transform_0, window_bounds = array<i64: 8, 11>}, {pipeline_mode = #tpu.pipeline_mode<synchronous>, transform_indices = @transform_1, window_bounds = array<i64: 11, 256>}, {pipeline_mode = #tpu.pipeline_mode<synchronous>, transform_indices = @transform_2, window_bounds = array<i64: 1, 256>}, {pipeline_mode = #tpu.pipeline_mode<synchronous>, transform_indices = @transform_3, window_bounds = array<i64: 256, 256>}, {pipeline_mode = #tpu.pipeline_mode<synchronous>, transform_indices = @transform_4, window_bounds = array<i64: 1, 256>}, {pipeline_mode = #tpu.pipeline_mode<synchronous>, transform_indices = @transform_5, window_bounds = array<i64: 1, 256>}, {pipeline_mode = #tpu.pipeline_mode<synchronous>, transform_indices = @transform_6, window_bounds = array<i64: 1, 1>}, {transform_indices = @transform_7, window_bounds = array<i64: 8, 1>}]} {
    %c0 = arith.constant 0 : index
    %c0_0 = arith.constant 0 : index
    %0 = vector.load %arg1[%c0, %c0_0] : memref<8x11xf32, #tpu.memory_space<vmem>>, vector<8x11xf32>
    %c0_1 = arith.constant 0 : index
    %c0_2 = arith.constant 0 : index
    %1 = vector.load %arg2[%c0_1, %c0_2] : memref<11x256xf32, #tpu.memory_space<vmem>>, vector<11x256xf32>
    %cst = arith.constant dense<0.000000e+00> : vector<8x256xf32>
    %2 = tpu.matmul %0, %1, %cst {dimension_numbers = #tpu.dot_dimension_numbers<[1], [0], [0], [1], [0, 0, 1, 1], [], []>} : vector<8x11xf32>, vector<11x256xf32>, vector<8x256xf32> -> vector<8x256xf32>
    %c0_3 = arith.constant 0 : index
    %c0_4 = arith.constant 0 : index
    %3 = vector.load %arg3[%c0_3, %c0_4] : memref<1x256xf32, #tpu.memory_space<vmem>>, vector<1x256xf32>
    %4 = vector.broadcast %3 : vector<1x256xf32> to vector<8x256xf32>
    %5 = arith.addf %2, %4 : vector<8x256xf32>
    %cst_5 = arith.constant 0.000000e+00 : f32
    %6 = vector.broadcast %cst_5 : f32 to vector<8x256xf32>
    %7 = arith.maximumf %5, %6 : vector<8x256xf32>
    %8 = arith.truncf %7 : vector<8x256xf32> to vector<8x256xbf16>
    %c0_6 = arith.constant 0 : index
    %c0_7 = arith.constant 0 : index
    %9 = vector.load %arg4[%c0_6, %c0_7] : memref<256x256xbf16, #tpu.memory_space<vmem>>, vector<256x256xbf16>
    %cst_8 = arith.constant dense<0.000000e+00> : vector<8x256xf32>
    %10 = tpu.matmul %8, %9, %cst_8 {dimension_numbers = #tpu.dot_dimension_numbers<[1], [0], [0], [1], [0, 0, 1, 1], [], []>} : vector<8x256xbf16>, vector<256x256xbf16>, vector<8x256xf32> -> vector<8x256xf32>
    %c0_9 = arith.constant 0 : index
    %c0_10 = arith.constant 0 : index
    %11 = vector.load %arg5[%c0_9, %c0_10] : memref<1x256xf32, #tpu.memory_space<vmem>>, vector<1x256xf32>
    %12 = vector.broadcast %11 : vector<1x256xf32> to vector<8x256xf32>
    %13 = arith.addf %10, %12 : vector<8x256xf32>
    %cst_11 = arith.constant 0.000000e+00 : f32
    %14 = vector.broadcast %cst_11 : f32 to vector<8x256xf32>
    %15 = arith.maximumf %13, %14 : vector<8x256xf32>
    %c0_12 = arith.constant 0 : index
    %c0_13 = arith.constant 0 : index
    %16 = vector.load %arg6[%c0_12, %c0_13] : memref<1x256xf32, #tpu.memory_space<vmem>>, vector<1x256xf32>
    %17 = vector.broadcast %16 : vector<1x256xf32> to vector<8x256xf32>
    %18 = arith.mulf %15, %17 : vector<8x256xf32>
    %cst_14 = arith.constant dense<0.000000e+00> : vector<8xf32>
    %19 = vector.multi_reduction <add>, %18, %cst_14 [1] : vector<8x256xf32> to vector<8xf32>
    %20 = vector.shape_cast %19 : vector<8xf32> to vector<8x1xf32>
    %c0_15 = arith.constant 0 : index
    %c0_16 = arith.constant 0 : index
    %21 = vector.load %arg7[%c0_15, %c0_16] : memref<1x1xf32, #tpu.memory_space<vmem>>, vector<1x1xf32>
    %22 = vector.broadcast %21 : vector<1x1xf32> to vector<8x1xf32>
    %23 = arith.addf %20, %22 : vector<8x1xf32>
    %c0_17 = arith.constant 0 : index
    %c0_18 = arith.constant 0 : index
    %24 = vector.load %arg8[%c0_17, %c0_18] : memref<8x1xf32, #tpu.memory_space<vmem>>, vector<8x1xf32>
    tpu.vector_store %arg8[%c0_17, %c0_18], %23 {strides = array<i32>} : memref<8x1xf32, #tpu.memory_space<vmem>>, vector<8x1xf32>,
    return
  }
  func.func @transform_0(%arg0: i32) -> (i32, i32) {
    %c0_i32 = arith.constant 0 : i32
    %c0_i32_0 = arith.constant 0 : i32
    return %arg0, %c0_i32 : i32, i32
  }
  func.func @transform_1(%arg0: i32) -> (i32, i32) {
    %c0_i32 = arith.constant 0 : i32
    %c0_i32_0 = arith.constant 0 : i32
    %c0_i32_1 = arith.constant 0 : i32
    return %c0_i32, %c0_i32_0 : i32, i32
  }
  func.func @transform_2(%arg0: i32) -> (i32, i32) {
    %c0_i32 = arith.constant 0 : i32
    %c0_i32_0 = arith.constant 0 : i32
    %c0_i32_1 = arith.constant 0 : i32
    return %c0_i32, %c0_i32_0 : i32, i32
  }
  func.func @transform_3(%arg0: i32) -> (i32, i32) {
    %c0_i32 = arith.constant 0 : i32
    %c0_i32_0 = arith.constant 0 : i32
    %c0_i32_1 = arith.constant 0 : i32
    return %c0_i32, %c0_i32_0 : i32, i32
  }
  func.func @transform_4(%arg0: i32) -> (i32, i32) {
    %c0_i32 = arith.constant 0 : i32
    %c0_i32_0 = arith.constant 0 : i32
    %c0_i32_1 = arith.constant 0 : i32
    return %c0_i32, %c0_i32_0 : i32, i32
  }
  func.func @transform_5(%arg0: i32) -> (i32, i32) {
    %c0_i32 = arith.constant 0 : i32
    %c0_i32_0 = arith.constant 0 : i32
    %c0_i32_1 = arith.constant 0 : i32
    return %c0_i32, %c0_i32_0 : i32, i32
  }
  func.func @transform_6(%arg0: i32) -> (i32, i32) {
    %c0_i32 = arith.constant 0 : i32
    %c0_i32_0 = arith.constant 0 : i32
    %c0_i32_1 = arith.constant 0 : i32
    return %c0_i32, %c0_i32_0 : i32, i32
  }
  func.func @transform_7(%arg0: i32) -> (i32, i32) {
    %c0_i32 = arith.constant 0 : i32
    %c0_i32_0 = arith.constant 0 : i32
    return %arg0, %c0_i32 : i32, i32
  }
}

</mosaic_0001>

<bundles_post_ra>
// kernel: qnet_forward.1
= control target key start
LH: loop header
LB: loop body
LE: loop exit
PB: predicated region body
PF: predicated region fallthrough
CT: control target
= control target key end

     0   :  { %s645_s0 = inlined_call_operand.vmem [shape: f32[8,11], index: 0, kind: input, shape index: {}]   ;;  %s646_s1 = inlined_call_operand.hbm [shape: f32[11,256], index: 1, kind: input, shape index: {}]   ;;  %s647_s2 = inlined_call_operand.vmem [shape: f32[1,256], index: 2, kind: input, shape index: {}]   ;;  %s648_s3 = inlined_call_operand.hbm [shape: bf16[256,256], index: 3, kind: input, shape index: {}]   ;;  %s649_s4 = inlined_call_operand.vmem [shape: f32[1,256], index: 4, kind: input, shape index: {}]   ;;  %s650_s5 = inlined_call_operand.vmem [shape: f32[1,256], index: 5, kind: input, shape index: {}]   ;;  %s651_s6 = inlined_call_operand.<no memory space> [shape: f32[1,1], index: 6, kind: input, shape index: {}]   ;;  %s652_s7 = inlined_call_operand.vmem [shape: f32[8,1], index: 7, kind: output, shape index: {}]  }
   0x1   :  { %v12_v0 = vstv %s651_s6 }
   0x2   :  { %13 = vst [vmem:[#allocation2] sm:$0x1] %v12_v0 }
   0x3   :  { %14 = vsyncpa [#allocation4], 0 }
   0x4   :  { %15 = vsyncpa [#allocation6], 0  ;;  %s574_s26 = smov [#allocation3]  }
   0x5   :  { %s23_s27 = sshll.u32 %s574_s26, 4  ;;  %s24_s27 = int_to_ptr.vmem [resolvable:$true] %s23_s27 }
   0x6   :  { %s538_s28 = scalar_lea.vmem %s24_s27, 512  ;;  %p543_p1 = scmp.lt.s32.totalorder %s24_s27, %s24_s27 }
   0x7   :  { %p539_p0 = scmp.ne.s32.totalorder %s24_s27, %s538_s28  ;;  %p544_p2 = scmp.lt.s32.totalorder %s538_s28, %s538_s28 }
   0x9   :  { %p545_p3 = por %p544_p2, %p543_p1 }
   0xb   :  { %p546_p4 = pnand %p545_p3, %p539_p0 }
   0xd   :  { %549 = shalt.err (!%p546_p4)
}
   0xe   :  { %s575_s29 = smov 256   ;;  %s576_s30 = smov 16  }
   0xf   :  { %29 = dma.hbm_to_vmem [thread:$0]  %s646_s1, 512, %s24_s27, [#allocation4], %s575_s29, %s575_s29, %s576_s30  }
  0x10   :  { %s577_s6 = smov [#allocation5]  }
  0x11   :  { %s37_s10 = sshll.u32 %s577_s6, 4  ;;  %s38_s10 = int_to_ptr.vmem [resolvable:$true] %s37_s10 }
  0x12   :  { %s558_s11 = scalar_lea.vmem %s38_s10, 4096  ;;  %p563_p6 = scmp.lt.s32.totalorder %s38_s10, %s38_s10 }
  0x13   :  { %p559_p5 = scmp.ne.s32.totalorder %s38_s10, %s558_s11  ;;  %p564_p7 = scmp.lt.s32.totalorder %s558_s11, %s558_s11 }
  0x15   :  { %p565_p8 = por %p564_p7, %p563_p6 }
  0x17   :  { %p566_p9 = pnand %p565_p8, %p559_p5 }
  0x19   :  { %569 = shalt.err (!%p566_p9)
}
  0x1a   :  { %s578_s12 = smov 128   ;;  %s579_s13 = smov 8  }
  0x1b   :  { %43 = dma.hbm_to_vmem [thread:$0]  %s648_s3, 4096, %s38_s10, [#allocation6], %s578_s12, %s578_s12, %s579_s13  }
  0x1c   :  { %570 = dma.done.wait [#allocation4], 512  }
  0x1d   :  { %571 = vsyncadd [#allocation4], 4294966784 }
  0x1e   :  { %572 = dma.done.wait [#allocation6], 4096  }
  0x1f   :  { %573 = vsyncadd [#allocation6], 4294963200  ;;  %v580_v1 = vmov 0.0   ;;  %vm77_vm0 = vcmask 1042432   ;;  %v60_v2 = vld [vmem:[#allocation3 + $0x18] sm:$0x7]  ;;  %v63_v39 = vlaneseq }
  0x20   :  { %148 = vmatprep.mubr.f32.mxu0 %v580_v1  ;;  %v59_v3 = vld [vmem:[#allocation3 + $0x10] sm:$0x7]  ;;  %v58_v4 = vld [vmem:[#allocation3 + $0x8] sm:$0xff]  ;;  %439 = vmatprep.subr.msk.mxu0 %vm77_vm0, %v60_v2  ;;  %v57_v5 = vld [vmem:[#allocation3] sm:$0xff]  ;;  %vm73_vm1 = vcmask 89088   ;;  %vm431_vm2 = vcmask 7168  }
  0x21   :  { %v56_v6 = vld [vmem:[%s645_s0] sm:$0xff]  ;;  %440 = vmatpush1.msk.msra.mxu0 %vm77_vm0, %v59_v3  ;;  %v484_v8 = vld [vmem:[#allocation5 + $0x70] ss:$8 sps:$4 sm:$0xff]   ;;  %v64_v40 = vshrl.u32 %v63_v39, 7 }
  0x22   :  { %v482_v7 = vld [vmem:[#allocation5 + $0x74] ss:$8 sps:$4 sm:$0xff]   ;;  %114 = vmatprep.subr.mxu0 %v58_v4  ;;  %v485_v9 = vld [vmem:[#allocation5 + $0x64] ss:$8 sps:$4 sm:$0xff]   ;;  %v487_v10 = vld [vmem:[#allocation5 + $0x60] ss:$8 sps:$4 sm:$0xff]  }
  0x23   :  { %115 = vmatpush1.msra.mxu0 %v57_v5  ;;  %363 = vmatprep.subr.bf16.mxu1 %v482_v7  ;;  %v488_v11 = vld [vmem:[#allocation5 + $0x54] ss:$8 sps:$4 sm:$0xff]   ;;  %v490_v12 = vld [vmem:[#allocation5 + $0x50] ss:$8 sps:$4 sm:$0xff]   ;;  %v491_v13 = vld [vmem:[#allocation5 + $0x44] ss:$8 sps:$4 sm:$0xff]  }
  0x24   :  { %441 = vmatmul.mubr.msk.f32.vlgmr.msra.gmra.mxu0 %vm73_vm1, %v56_v6  ;;  %364 = vmatpush1.bf16.msra.mxu1 %v484_v8  ;;  %v493_v14 = vld [vmem:[#allocation5 + $0x40] ss:$8 sps:$4 sm:$0xff]   ;;  %v494_v15 = vld [vmem:[#allocation5 + $0x34] ss:$8 sps:$4 sm:$0xff]   ;;  %v496_v16 = vld [vmem:[#allocation5 + $0x30] ss:$8 sps:$4 sm:$0xff]  }
  0x25   :  { %365 = vmatprep.subr.bf16.mxu1 %v485_v9  ;;  %v497_v17 = vld [vmem:[#allocation5 + $0x24] ss:$8 sps:$4 sm:$0xff]   ;;  %v499_v18 = vld [vmem:[#allocation5 + $0x20] ss:$8 sps:$4 sm:$0xff]   ;;  %v500_v19 = vld [vmem:[#allocation5 + $0x14] ss:$8 sps:$4 sm:$0xff]  }
  0x26   :  { %v502_v20 = vld [vmem:[#allocation5 + $0x10] ss:$8 sps:$4 sm:$0xff]   ;;  %v503_v21 = vld [vmem:[#allocation5 + $0x4] ss:$8 sps:$4 sm:$0xff]   ;;  %v505_v22 = vld [vmem:[#allocation5] ss:$8 sps:$4 sm:$0xff]  }
  0x27   :  { %v506_v23 = vld [vmem:[#allocation5 + $0xf4] ss:$8 sps:$4 sm:$0xff]   ;;  %v508_v24 = vld [vmem:[#allocation5 + $0xf0] ss:$8 sps:$4 sm:$0xff]   ;;  %v509_v25 = vld [vmem:[#allocation5 + $0xe4] ss:$8 sps:$4 sm:$0xff]  }
  0x28   :  { %366 = vmatpush1.bf16.msra.mxu1 %v487_v10  ;;  %v511_v26 = vld [vmem:[#allocation5 + $0xe0] ss:$8 sps:$4 sm:$0xff]   ;;  %v512_v27 = vld [vmem:[#allocation5 + $0xd4] ss:$8 sps:$4 sm:$0xff]   ;;  %v514_v28 = vld [vmem:[#allocation5 + $0xd0] ss:$8 sps:$4 sm:$0xff]  }
  0x29   :  { %367 = vmatprep.subr.bf16.mxu1 %v488_v11  ;;  %v515_v29 = vld [vmem:[#allocation5 + $0xc4] ss:$8 sps:$4 sm:$0xff]   ;;  %v517_v30 = vld [vmem:[#allocation5 + $0xc0] ss:$8 sps:$4 sm:$0xff]   ;;  %v518_v31 = vld [vmem:[#allocation5 + $0xb4] ss:$8 sps:$4 sm:$0xff]  }
  0x2a   :  { %v520_v32 = vld [vmem:[#allocation5 + $0xb0] ss:$8 sps:$4 sm:$0xff]   ;;  %v521_v33 = vld [vmem:[#allocation5 + $0xa4] ss:$8 sps:$4 sm:$0xff]   ;;  %v523_v34 = vld [vmem:[#allocation5 + $0xa0] ss:$8 sps:$4 sm:$0xff]  }
  0x2b   :  { %v524_v35 = vld [vmem:[#allocation5 + $0x94] ss:$8 sps:$4 sm:$0xff]   ;;  %v526_v36 = vld [vmem:[#allocation5 + $0x90] ss:$8 sps:$4 sm:$0xff]   ;;  %v527_v37 = vld [vmem:[#allocation5 + $0x84] ss:$8 sps:$4 sm:$0xff]  }
  0x2c   :  { %368 = vmatpush1.bf16.msra.mxu1 %v490_v12  ;;  %v529_v38 = vld [vmem:[#allocation5 + $0x80] ss:$8 sps:$4 sm:$0xff]   ;;  %v65_v41 = vsub.s32 0, %v64_v40  ;;  %v69_v43 = vsub.s32 1, %v64_v40  ;;  %v474_v7 = vld [vmem:[#allocation2] ss:$0 sm:$0xff] }
  0x2d   :  { %369 = vmatprep.subr.bf16.mxu1 %v491_v13  ;;  %v61_v42 = vld [vmem:[%s647_s2] sm:$0x3] }
  0x2e   :  { %v66_v44 = vrot.slane %v61_v42, %v65_v41  ;;  %v70_v45 = vrot.slane %v61_v42, %v69_v43  ;;  %v191_v54 = vld [vmem:[%s649_s4] sm:$0x3] }
  0x2f   :  { %v196_v55 = vrot.slane %v191_v54, %v65_v41  ;;  %v200_v56 = vrot.slane %v191_v54, %v69_v43  ;;  %v406_v58 = vld [vmem:[%s650_s5] sm:$0x3] }
  0x30   :  { %370 = vmatpush1.bf16.msra.mxu1 %v493_v14  ;;  %v411_v63 = vrot.slane %v406_v58, %v65_v41  ;;  %v415_v0 = vrot.slane %v406_v58, %v69_v43 }
  0x31   :  { %371 = vmatprep.subr.bf16.mxu1 %v494_v15 }
  0x34   :  { %372 = vmatpush1.bf16.msra.mxu1 %v496_v16 }
  0x35   :  { %373 = vmatprep.subr.bf16.mxu1 %v497_v17 }
  0x38   :  { %374 = vmatpush1.bf16.msra.mxu1 %v499_v18 }
  0x39   :  { %375 = vmatprep.subr.bf16.mxu1 %v500_v19 }
  0x3c   :  { %376 = vmatpush1.bf16.msra.mxu1 %v502_v20 }
  0x3d   :  { %377 = vmatprep.subr.bf16.mxu1 %v503_v21 }
  0x40   :  { %378 = vmatpush1.bf16.msra.mxu1 %v505_v22 }
  0x41   :  { %379 = vmatprep.subr.bf16.mxu1 %v506_v23 }
  0x44   :  { %380 = vmatpush2.bf16.msra.mxu1 %v508_v24 }
  0x45   :  { %381 = vmatprep.subr.bf16.mxu1 %v509_v25 }
  0x48   :  { %382 = vmatpush2.bf16.msra.mxu1 %v511_v26 }
  0x49   :  { %383 = vmatprep.subr.bf16.mxu1 %v512_v27 }
  0x4c   :  { %384 = vmatpush2.bf16.msra.mxu1 %v514_v28 }
  0x4d   :  { %385 = vmatprep.subr.bf16.mxu1 %v515_v29 }
  0x50   :  { %386 = vmatpush2.bf16.msra.mxu1 %v517_v30 }
  0x51   :  { %387 = vmatprep.subr.bf16.mxu1 %v518_v31 }
  0x54   :  { %388 = vmatpush2.bf16.msra.mxu1 %v520_v32 }
  0x55   :  { %389 = vmatprep.subr.bf16.mxu1 %v521_v33 }
  0x58   :  { %390 = vmatpush2.bf16.msra.mxu1 %v523_v34 }
  0x59   :  { %391 = vmatprep.subr.bf16.mxu1 %v524_v35 }
  0x5c   :  { %392 = vmatpush2.bf16.msra.mxu1 %v526_v36 }
  0x5d   :  { %393 = vmatprep.subr.bf16.mxu1 %v527_v37 }
  0x60   :  { %394 = vmatpush2.bf16.msra.mxu1 %v529_v38 }
  0xe4   :  { %v150_v46 = vpop.f32.mrf.mxu0 }
  0xe5   :  { %v151_v47 = vadd.f32 %v150_v46, %v66_v44 }
  0xe6   :  { %v152_v48 = vpop.f32.mrf.mxu0 }
  0xe7   :  { %v153_v49 = vadd.f32 %v152_v48, %v70_v45  ;;  %v155_v50 = vmax.f32 %v151_v47, 0.0 }
  0xe9   :  { %v156_v51 = vmax.f32 %v153_v49, 0.0  ;;  %v157_v53 = vpack.c.bf16 %v155_v50, %v155_v50 }
  0xeb   :  { %v158_v52 = vpack.c.bf16 %v156_v51, %v156_v51 }
  0xed   :  { %395 = vmatprep.mubr.bf16.mxu1 %v158_v52 }
  0xee   :  { %396 = vmatmul.mubr.bf16.vlgmr.msra.gmra.mxu1 %v157_v53 }
 0x1ae   :  { %v397_v57 = vpop.f32.mrf.mxu1 }
 0x1af   :  { %v398_v59 = vadd.f32 %v397_v57, %v196_v55 }
 0x1b0   :  { %v399_v60 = vpop.f32.mrf.mxu1 }
 0x1b1   :  { %v404_v61 = vmax.f32 %v398_v59, 0.0  ;;  %v400_v62 = vadd.f32 %v399_v60, %v200_v56 }
 0x1b2   :  { %v401_v1 = vpop.f32.mrf.mxu1 }
 0x1b3   :  { %v405_v2 = vmax.f32 %v400_v62, 0.0  ;;  %v418_v4 = vmul.f32 %v411_v63, %v404_v61 }
 0x1b4   :  { %v402_v3 = vpop.f32.mrf.mxu1 }
 0x1b5   :  { %v419_v5 = vmul.f32 %v415_v0, %v405_v2 }
 0x1b7   :  { %v420_v6 = vadd.f32 %v419_v5, %v418_v4 }
 0x1b9   :  { %421 = vadd.xlane.f32.xlu0 %v420_v6 }
 0x242   :  { %v422_v8 = vpop.xlane.xlu0 %421 }
 0x243   :  { %v430_v9 = vadd.f32 %v474_v7, %v422_v8 }
 0x245   :  { %432 = vst.msk [vmem:[%s652_s7] sm:$0xff] %vm431_vm2, %v430_v9 }
 0x246   :  { %437 = vsyncpa [#allocation4], 1 }
 0x247   :  { %438 = vsyncpa [#allocation6], 1 }

</bundles_post_ra>
